<compile_context>
chip_gen: v7x
topology: tpu7x:2x2x1
jax: 0.10.0
libtpu: 0.0.40
codegen_flags: <defaults>
</compile_context>

<pallas_src>
from functools import partial

import jax
import jax.numpy as jnp
import numpy as np
from jax import lax
from jax.experimental import pallas as pl
from jax.experimental.pallas import tpu as pltpu


# --------------------------------------------------------------------------
# Pallas conv kernel (reflect-padded conv + bias [+ ReLU] [+ residual])
# --------------------------------------------------------------------------
def _make_conv_kernel(tap_plan, cin, cpad, span, pitch, ho, wo,
                      n_phases, has_residual, relu):
    """tap_plan[t] = (phase_index, flat_shift); all static Python ints.

    The kernel stages the full-image im2col pattern with one wide lane-slice
    copy per tap, runs a single MXU contraction over the whole image, applies
    the bias/ReLU epilogue at slab granularity, compacts the padded row pitch
    down to Wo, fuses the residual add, and stores one lane-dense output block.
    """

    def kernel(*refs):
        phase_refs = refs[:n_phases]
        pos = n_phases
        res_ref = refs[pos] if has_residual else None
        if has_residual:
            pos += 1
        w_ref, b_ref, o_ref, pat_ref = refs[pos], refs[pos + 1], refs[pos + 2], refs[pos + 3]

        # ---- staging: one wide copy per tap (K*K copies total, ~span lanes each)
        if cpad != cin:
            zero_rows = jnp.zeros((cpad - cin, span), dtype=pat_ref.dtype)
        for t, (ph, s) in enumerate(tap_plan):
            pat_ref[t * cpad:t * cpad + cin, :] = phase_refs[ph][0, :, s:s + span]
            if cpad != cin:
                # Keep the sublane-alignment padding rows zero (their weight
                # columns are zero, so they never contribute).
                pat_ref[t * cpad + cin:(t + 1) * cpad, :] = zero_rows

        # ---- one fused MXU contraction for the whole image:
        #      (Cout, K*K*Cpad) @ (K*K*Cpad, span) -> (Cout, span), f32 accumulate
        acc = jnp.dot(w_ref[...], pat_ref[...], preferred_element_type=jnp.float32)
        acc = acc + b_ref[...]
        if relu:
            acc = jnp.maximum(acc, 0.0)

        # ---- compaction: valid outputs live at columns i*pitch + j (j < Wo);
        #      drop the pad columns and fill the lane-dense output block.
        # TODO(synk): group rows into 128-lane-aligned slabs / fori_loop for
        # large Ho; at these sizes Ho <= 32 unrolled stores are fine.
        for i in range(ho):
            o_ref[0, :, i * wo:(i + 1) * wo] = \
                acc[:, i * pitch:i * pitch + wo].astype(o_ref.dtype)

        if has_residual:
            # Residual is kept float32; add at full-slab granularity.
            o_ref[0, :, :] = (o_ref[0, :, :].astype(jnp.float32)
                              + res_ref[0, :, :]).astype(o_ref.dtype)

    return kernel


def pallas_conv2d(x, w, b, *, stride=1, upsample=False, relu=True,
                  residual=None, compute_dtype=None):
    """Conv2d(kernel K, reflect pad K//2, stride) + bias [+ ReLU] [+ residual].

    x: (N, Cin, H, W) NCHW, w: (Cout, Cin, K, K), b: (Cout,).
    `upsample=True` applies nn.Upsample(scale_factor=2, mode='nearest') before
    a stride-1 conv.  Returns (N, Cout, Ho, Wo) in `compute_dtype`.
    """
    N, Cin, H, W = x.shape
    Cout, Cin_w, K, K2 = w.shape
    assert Cin_w == Cin and K == K2 and K % 2 == 1
    p = K // 2
    cdt = jnp.dtype(compute_dtype) if compute_dtype is not None else jnp.dtype(x.dtype)
    xin = x.astype(cdt)

    if upsample:
        assert stride == 1
        # TODO(synk): fold the nearest-neighbour repeat into the kernel
        # (sub-pixel / folded-kernel formulation) instead of materialising the
        # 2x tensor in glue.
        xin = jnp.repeat(jnp.repeat(xin, 2, axis=2), 2, axis=3)
        H, W = 2 * H, 2 * W

    if stride == 1:
        Ho, Wo = H, W
        pitch = W + 2 * p
        xp = jnp.pad(xin, ((0, 0), (0, 0), (p, p), (p, p)), mode='reflect')
        phases = [xp.reshape(N, Cin, -1)]          # flat (C, pH*pW), lane-dense

        def tap(ky, kx):
            return (0, ky * pitch + kx)

    elif stride == 2:
        assert H % 2 == 0 and W % 2 == 0
        Ho, Wo = H // 2, W // 2
        pitch = (W + 2 * p) // 2
        xp = jnp.pad(xin, ((0, 0), (0, 0), (p, p), (p, p)), mode='reflect')
        # Even/odd phase split (pure indexing) so the stride-2 conv only needs
        # unit-stride lane slices inside the kernel.
        # TODO(synk): fold the reflect pad + phase split into the kernel to
        # save the glue HBM round trip.
        phases = [xp[:, :, a::2, bb::2].reshape(N, Cin, -1)
                  for a in range(2) for bb in range(2)]

        def tap(ky, kx):
            return (2 * (ky % 2) + (kx % 2), (ky // 2) * pitch + (kx // 2))

    else:
        raise NotImplementedError(f"stride={stride}")

    KK = K * K
    span = (Ho - 1) * pitch + Wo               # matmul N-dim (lane-dense)
    tap_plan = tuple(tap(ky, kx) for ky in range(K) for kx in range(K))

    # Sublane-aligned channel stride inside the im2col pattern scratch.
    gran = 8 if jnp.dtype(cdt).itemsize >= 4 else 16
    cpad = -(-Cin // gran) * gran

    # Weight as (Cout, K*K*Cpad): column block t = (ky*K + kx) holds
    # w[:, :, ky, kx], with zeros in the alignment-padding columns.
    wt = jnp.transpose(w, (2, 3, 1, 0)).reshape(KK, Cin, Cout)
    wt = jnp.pad(wt, ((0, 0), (0, cpad - Cin), (0, 0)))
    w_mat = jnp.transpose(wt.reshape(KK * cpad, Cout), (1, 0)).astype(cdt)
    b_col = b.reshape(Cout, 1).astype(jnp.float32)

    Lp = phases[0].shape[-1]
    has_residual = residual is not None

    inputs = list(phases)
    in_specs = [pl.BlockSpec((1, Cin, Lp), lambda n: (n, 0, 0)) for _ in phases]
    if has_residual:
        # Residual stays float32 (added in f32 inside the kernel).
        inputs.append(residual.reshape(N, Cout, Ho * Wo).astype(jnp.float32))
        in_specs.append(pl.BlockSpec((1, Cout, Ho * Wo), lambda n: (n, 0, 0)))
    inputs += [w_mat, b_col]
    in_specs += [pl.BlockSpec((Cout, KK * cpad), lambda n: (0, 0)),
                 pl.BlockSpec((Cout, 1), lambda n: (0, 0))]

    kernel = _make_conv_kernel(tap_plan, Cin, cpad, span, pitch, Ho, Wo,
                               len(phases), has_residual, relu)

    # TODO(synk): for realistic image sizes add a second "parallel" grid axis
    # over halo'd output-row tiles (re-budget against v7x's 64 MiB VMEM and
    # feed both of its TensorCores); full-image blocks per batch element are
    # fine at these sizes.
    # TODO(synk): fuse the `width` repeated same-weight resblock convs into a
    # single pallas_call keeping the activation resident in VMEM.
    out = pl.pallas_call(
        kernel,
        out_shape=jax.ShapeDtypeStruct((N, Cout, Ho * Wo), cdt),
        grid_spec=pltpu.PrefetchScalarGridSpec(
            num_scalar_prefetch=0,
            grid=(N,),
            in_specs=in_specs,
            out_specs=pl.BlockSpec((1, Cout, Ho * Wo), lambda n: (n, 0, 0)),
            scratch_shapes=[pltpu.VMEM((KK * cpad, span), cdt)],
        ),
        compiler_params=pltpu.CompilerParams(
            dimension_semantics=("parallel",),
            vmem_limit_bytes=48 * 1024 * 1024,
        ),
    )(*inputs)
    return out.reshape(N, Cout, Ho, Wo)


# --------------------------------------------------------------------------
# Pure-JAX reference conv (mirrors PyTorch semantics)
# --------------------------------------------------------------------------
def ref_conv2d(x, w, b, *, stride=1, upsample=False, relu=True, residual=None):
    if upsample:
        x = jnp.repeat(jnp.repeat(x, 2, axis=2), 2, axis=3)
    K = w.shape[2]
    p = K // 2
    xp = jnp.pad(x, ((0, 0), (0, 0), (p, p), (p, p)), mode='reflect')
    y = lax.conv_general_dilated(
        xp, w, window_strides=(stride, stride), padding='VALID',
        dimension_numbers=('NCHW', 'OIHW', 'NCHW'),
        precision=lax.Precision.HIGHEST)
    y = y + b.reshape(1, -1, 1, 1)
    if relu:
        y = jnp.maximum(y, 0.0)
    if residual is not None:
        y = y + residual
    return y


# --------------------------------------------------------------------------
# UNet forward (shared between the Pallas and reference conv implementations)
# --------------------------------------------------------------------------
def unet_forward(x, params, conv_fn, *, depth, width):
    def conv(h, p, **kw):
        return conv_fn(h, p['w'], p['b'], **kw)

    def resblock(h, p, n_convs):
        # nn.Sequential([Conv(...)] * n_convs): the SAME conv weights applied
        # n_convs times; the residual add is fused into the last conv epilogue.
        y = h
        for j in range(n_convs):
            y = conv(y, p, residual=(h if j == n_convs - 1 else None))
        return y

    x = conv(x, params['in_conv'])
    skips = []
    for i in range(depth):
        pe = params['enc'][i]
        skip = resblock(x, pe['res'], width)
        skips.append(skip)
        x = conv(skip, pe['down'], stride=2)
    for pd in params['dec']:
        x = resblock(x, pd['res'], width)
        x = conv(x, pd['up'], upsample=True)
        skip = skips.pop()
        xcat = jnp.concatenate([skip, x], axis=1)   # torch.cat([skip, x], dim=1)
        xcat = resblock(xcat, pd['merge_res'], 1)
        x = conv(xcat, pd['merge_out'])
    x = resblock(x, params['out_res'], width)
    x = conv(x, params['out_conv'], relu=False)
    return x


def pallas_unet(x, params, *, depth, width, compute_dtype=jnp.float32):
    conv_fn = partial(pallas_conv2d, compute_dtype=compute_dtype)
    y = unet_forward(x.astype(compute_dtype), params, conv_fn,
                     depth=depth, width=width)
    return y.astype(jnp.float32)


# --------------------------------------------------------------------------
# Deterministic parameter construction
# --------------------------------------------------------------------------
def init_conv(key, cin, cout, K):
    kw_, kb_ = jax.random.split(key)
    w = jax.random.normal(kw_, (cout, cin, K, K), jnp.float32) * np.sqrt(2.0 / (cin * K * K))
    b = jax.random.normal(kb_, (cout,), jnp.float32) * 0.01
    return {'w': w, 'b': b}


def init_unet(key, *, colour_channels, start_filters, kernel_size, depth):
    keys = iter(jax.random.split(key, 4 + 6 * depth))
    K = kernel_size
    params = {'in_conv': init_conv(next(keys), colour_channels, start_filters, K)}
    params['enc'] = []
    for i in range(depth):
        ch = start_filters * 2 ** i
        params['enc'].append({'res': init_conv(next(keys), ch, ch, K),
                              'down': init_conv(next(keys), ch, 2 * ch, K)})
    params['dec'] = []
    for i in reversed(range(depth)):
        ch = start_filters * 2 ** i
        params['dec'].append({'res': init_conv(next(keys), 2 * ch, 2 * ch, K),
                              'up': init_conv(next(keys), 2 * ch, ch, K),
                              'merge_res': init_conv(next(keys), 2 * ch, 2 * ch, K),
                              'merge_out': init_conv(next(keys), 2 * ch, ch, K)})
    params['out_res'] = init_conv(next(keys), start_filters, start_filters, K)
    params['out_conv'] = init_conv(next(keys), start_filters, colour_channels, K)
    return params


def rel_l2(a, b):
    a = np.asarray(a, dtype=np.float64)
    b = np.asarray(b, dtype=np.float64)
    return float(np.linalg.norm(a - b) / (np.linalg.norm(b) + 1e-12))


# --------------------------------------------------------------------------
if __name__ == "__main__":
    N, C, H, W = 2, 1, 16, 16
    depth, width, sf, K = 2, 2, 4, 3

    key = jax.random.PRNGKey(0)
    k_x, k_p, k_r = jax.random.split(key, 3)
    x = jax.random.normal(k_x, (N, C, H, W), jnp.float32)
    params = init_unet(k_p, colour_channels=C, start_filters=sf,
                       kernel_size=K, depth=depth)

    w0, b0 = params['in_conv']['w'], params['in_conv']['b']

    # ---- single-conv checks (f32) for each mode of the fused kernel ----
    res0 = jax.random.normal(k_r, (N, sf, H, W), jnp.float32)
    y1 = jax.block_until_ready(pallas_conv2d(x, w0, b0, residual=res0))
    r1 = ref_conv2d(x, w0, b0, residual=res0)
    assert y1.shape == r1.shape and rel_l2(y1, r1) < 2e-2, rel_l2(y1, r1)

    y2 = jax.block_until_ready(pallas_conv2d(x, w0, b0, stride=2))
    r2 = ref_conv2d(x, w0, b0, stride=2)
    assert y2.shape == r2.shape and rel_l2(y2, r2) < 2e-2, rel_l2(y2, r2)

    y3 = jax.block_until_ready(pallas_conv2d(x, w0, b0, upsample=True))
    r3 = ref_conv2d(x, w0, b0, upsample=True)
    assert y3.shape == r3.shape and rel_l2(y3, r3) < 2e-2, rel_l2(y3, r3)

    # ---- bf16 smoke tests (v6e/v7x option; f32 accumulation in-kernel) ----
    y2b = jax.block_until_ready(
        pallas_conv2d(x, w0, b0, stride=2, compute_dtype=jnp.bfloat16))
    assert y2b.shape == r2.shape
    assert float(jnp.max(jnp.abs(y2b.astype(jnp.float32) - r2))) < 0.15
    y3b = jax.block_until_ready(
        pallas_conv2d(x, w0, b0, upsample=True, compute_dtype=jnp.bfloat16))
    assert y3b.shape == r3.shape
    assert float(jnp.max(jnp.abs(y3b.astype(jnp.float32) - r3))) < 0.15

    # ---- full UNet forward: Pallas vs pure-JAX reference ----
    pallas_fn = jax.jit(partial(pallas_unet, depth=depth, width=width,
                                compute_dtype=jnp.float32))
    ref_fn = jax.jit(partial(unet_forward, conv_fn=ref_conv2d,
                             depth=depth, width=width))

    out = jax.block_until_ready(pallas_fn(x, params))
    ref = jax.block_until_ready(ref_fn(x, params))
    assert out.shape == ref.shape == (N, C, H, W), (out.shape, ref.shape)
    e = rel_l2(out, ref)
    assert np.isfinite(np.asarray(out)).all()
    # Loose only to tolerate MXU f32 pass-precision drift over ~20 conv layers.
    assert e < 1e-1, e

    print("KERNEL_OK")
</pallas_src>

<mosaic_0001>
module attributes {stable_mosaic.version = 11 : i64} {
  func.func @kernel(%arg0: i32, %arg1: memref<1x1x324xf32, #tpu.memory_space<vmem>>, %arg2: memref<1x4x256xf32, #tpu.memory_space<vmem>>, %arg3: memref<4x72xf32, #tpu.memory_space<vmem>>, %arg4: memref<4x1xf32, #tpu.memory_space<vmem>>, %arg5: memref<1x4x256xf32, #tpu.memory_space<vmem>>, %arg6: memref<72x286xf32, #tpu.memory_space<vmem>>) attributes {dimension_semantics = [#tpu.dimension_semantics<parallel>], iteration_bounds = array<i64: 2>, scalar_prefetch = 0 : i64, scratch_operands = 1 : i64, tpu.core_type = #tpu.core_type<tc>, window_params = [{transform_indices = @transform_0, window_bounds = array<i64: 1, 1, 324>}, {transform_indices = @transform_1, window_bounds = array<i64: 1, 4, 256>}, {pipeline_mode = #tpu.pipeline_mode<synchronous>, transform_indices = @transform_2, window_bounds = array<i64: 4, 72>}, {pipeline_mode = #tpu.pipeline_mode<synchronous>, transform_indices = @transform_3, window_bounds = array<i64: 4, 1>}, {transform_indices = @transform_4, window_bounds = array<i64: 1, 4, 256>}]} {
    %cst = arith.constant 0.000000e+00 : f32
    %0 = vector.broadcast %cst : f32 to vector<7x286xf32>
    %c0 = arith.constant 0 : index
    %c0_0 = arith.constant 0 : index
    %c0_1 = arith.constant 0 : index
    %1 = vector.load %arg1[%c0, %c0_0, %c0_1] : memref<1x1x324xf32, #tpu.memory_space<vmem>>, vector<1x1x286xf32>
    %2 = vector.shape_cast %1 : vector<1x1x286xf32> to vector<1x286xf32>
    %c0_2 = arith.constant 0 : index
    %c0_3 = arith.constant 0 : index
    %3 = vector.load %arg6[%c0_2, %c0_3] : memref<72x286xf32, #tpu.memory_space<vmem>>, vector<1x286xf32>
    tpu.vector_store %arg6[%c0_2, %c0_3], %2 {strides = array<i32>} : memref<72x286xf32, #tpu.memory_space<vmem>>, vector<1x286xf32>,
    %c1 = arith.constant 1 : index
    %c0_4 = arith.constant 0 : index
    %4 = vector.load %arg6[%c1, %c0_4] : memref<72x286xf32, #tpu.memory_space<vmem>>, vector<7x286xf32>
    tpu.vector_store %arg6[%c1, %c0_4], %0 {strides = array<i32>} : memref<72x286xf32, #tpu.memory_space<vmem>>, vector<7x286xf32>,
    %c0_5 = arith.constant 0 : index
    %c0_6 = arith.constant 0 : index
    %c1_7 = arith.constant 1 : index
    %5 = vector.load %arg1[%c0_5, %c0_6, %c1_7] : memref<1x1x324xf32, #tpu.memory_space<vmem>>, vector<1x1x286xf32>
    %6 = vector.shape_cast %5 : vector<1x1x286xf32> to vector<1x286xf32>
    %c8 = arith.constant 8 : index
    %c0_8 = arith.constant 0 : index
    %7 = vector.load %arg6[%c8, %c0_8] : memref<72x286xf32, #tpu.memory_space<vmem>>, vector<1x286xf32>
    tpu.vector_store %arg6[%c8, %c0_8], %6 {strides = array<i32>} : memref<72x286xf32, #tpu.memory_space<vmem>>, vector<1x286xf32>,
    %c9 = arith.constant 9 : index
    %c0_9 = arith.constant 0 : index
    %8 = vector.load %arg6[%c9, %c0_9] : memref<72x286xf32, #tpu.memory_space<vmem>>, vector<7x286xf32>
    tpu.vector_store %arg6[%c9, %c0_9], %0 {strides = array<i32>} : memref<72x286xf32, #tpu.memory_space<vmem>>, vector<7x286xf32>,
    %c0_10 = arith.constant 0 : index
    %c0_11 = arith.constant 0 : index
    %c2 = arith.constant 2 : index
    %9 = vector.load %arg1[%c0_10, %c0_11, %c2] : memref<1x1x324xf32, #tpu.memory_space<vmem>>, vector<1x1x286xf32>
    %10 = vector.shape_cast %9 : vector<1x1x286xf32> to vector<1x286xf32>
    %c16 = arith.constant 16 : index
    %c0_12 = arith.constant 0 : index
    %11 = vector.load %arg6[%c16, %c0_12] : memref<72x286xf32, #tpu.memory_space<vmem>>, vector<1x286xf32>
    tpu.vector_store %arg6[%c16, %c0_12], %10 {strides = array<i32>} : memref<72x286xf32, #tpu.memory_space<vmem>>, vector<1x286xf32>,
    %c17 = arith.constant 17 : index
    %c0_13 = arith.constant 0 : index
    %12 = vector.load %arg6[%c17, %c0_13] : memref<72x286xf32, #tpu.memory_space<vmem>>, vector<7x286xf32>
    tpu.vector_store %arg6[%c17, %c0_13], %0 {strides = array<i32>} : memref<72x286xf32, #tpu.memory_space<vmem>>, vector<7x286xf32>,
    %c0_14 = arith.constant 0 : index
    %c0_15 = arith.constant 0 : index
    %c18 = arith.constant 18 : index
    %13 = vector.load %arg1[%c0_14, %c0_15, %c18] : memref<1x1x324xf32, #tpu.memory_space<vmem>>, vector<1x1x286xf32>
    %14 = vector.shape_cast %13 : vector<1x1x286xf32> to vector<1x286xf32>
    %c24 = arith.constant 24 : index
    %c0_16 = arith.constant 0 : index
    %15 = vector.load %arg6[%c24, %c0_16] : memref<72x286xf32, #tpu.memory_space<vmem>>, vector<1x286xf32>
    tpu.vector_store %arg6[%c24, %c0_16], %14 {strides = array<i32>} : memref<72x286xf32, #tpu.memory_space<vmem>>, vector<1x286xf32>,
    %c25 = arith.constant 25 : index
    %c0_17 = arith.constant 0 : index
    %16 = vector.load %arg6[%c25, %c0_17] : memref<72x286xf32, #tpu.memory_space<vmem>>, vector<7x286xf32>
    tpu.vector_store %arg6[%c25, %c0_17], %0 {strides = array<i32>} : memref<72x286xf32, #tpu.memory_space<vmem>>, vector<7x286xf32>,
    %c0_18 = arith.constant 0 : index
    %c0_19 = arith.constant 0 : index
    %c19 = arith.constant 19 : index
    %17 = vector.load %arg1[%c0_18, %c0_19, %c19] : memref<1x1x324xf32, #tpu.memory_space<vmem>>, vector<1x1x286xf32>
    %18 = vector.shape_cast %17 : vector<1x1x286xf32> to vector<1x286xf32>
    %c32 = arith.constant 32 : index
    %c0_20 = arith.constant 0 : index
    %19 = vector.load %arg6[%c32, %c0_20] : memref<72x286xf32, #tpu.memory_space<vmem>>, vector<1x286xf32>
    tpu.vector_store %arg6[%c32, %c0_20], %18 {strides = array<i32>} : memref<72x286xf32, #tpu.memory_space<vmem>>, vector<1x286xf32>,
    %c33 = arith.constant 33 : index
    %c0_21 = arith.constant 0 : index
    %20 = vector.load %arg6[%c33, %c0_21] : memref<72x286xf32, #tpu.memory_space<vmem>>, vector<7x286xf32>
    tpu.vector_store %arg6[%c33, %c0_21], %0 {strides = array<i32>} : memref<72x286xf32, #tpu.memory_space<vmem>>, vector<7x286xf32>,
    %c0_22 = arith.constant 0 : index
    %c0_23 = arith.constant 0 : index
    %c20 = arith.constant 20 : index
    %21 = vector.load %arg1[%c0_22, %c0_23, %c20] : memref<1x1x324xf32, #tpu.memory_space<vmem>>, vector<1x1x286xf32>
    %22 = vector.shape_cast %21 : vector<1x1x286xf32> to vector<1x286xf32>
    %c40 = arith.constant 40 : index
    %c0_24 = arith.constant 0 : index
    %23 = vector.load %arg6[%c40, %c0_24] : memref<72x286xf32, #tpu.memory_space<vmem>>, vector<1x286xf32>
    tpu.vector_store %arg6[%c40, %c0_24], %22 {strides = array<i32>} : memref<72x286xf32, #tpu.memory_space<vmem>>, vector<1x286xf32>,
    %c41 = arith.constant 41 : index
    %c0_25 = arith.constant 0 : index
    %24 = vector.load %arg6[%c41, %c0_25] : memref<72x286xf32, #tpu.memory_space<vmem>>, vector<7x286xf32>
    tpu.vector_store %arg6[%c41, %c0_25], %0 {strides = array<i32>} : memref<72x286xf32, #tpu.memory_space<vmem>>, vector<7x286xf32>,
    %c0_26 = arith.constant 0 : index
    %c0_27 = arith.constant 0 : index
    %c36 = arith.constant 36 : index
    %25 = vector.load %arg1[%c0_26, %c0_27, %c36] : memref<1x1x324xf32, #tpu.memory_space<vmem>>, vector<1x1x286xf32>
    %26 = vector.shape_cast %25 : vector<1x1x286xf32> to vector<1x286xf32>
    %c48 = arith.constant 48 : index
    %c0_28 = arith.constant 0 : index
    %27 = vector.load %arg6[%c48, %c0_28] : memref<72x286xf32, #tpu.memory_space<vmem>>, vector<1x286xf32>
    tpu.vector_store %arg6[%c48, %c0_28], %26 {strides = array<i32>} : memref<72x286xf32, #tpu.memory_space<vmem>>, vector<1x286xf32>,
    %c49 = arith.constant 49 : index
    %c0_29 = arith.constant 0 : index
    %28 = vector.load %arg6[%c49, %c0_29] : memref<72x286xf32, #tpu.memory_space<vmem>>, vector<7x286xf32>
    tpu.vector_store %arg6[%c49, %c0_29], %0 {strides = array<i32>} : memref<72x286xf32, #tpu.memory_space<vmem>>, vector<7x286xf32>,
    %c0_30 = arith.constant 0 : index
    %c0_31 = arith.constant 0 : index
    %c37 = arith.constant 37 : index
    %29 = vector.load %arg1[%c0_30, %c0_31, %c37] : memref<1x1x324xf32, #tpu.memory_space<vmem>>, vector<1x1x286xf32>
    %30 = vector.shape_cast %29 : vector<1x1x286xf32> to vector<1x286xf32>
    %c56 = arith.constant 56 : index
    %c0_32 = arith.constant 0 : index
    %31 = vector.load %arg6[%c56, %c0_32] : memref<72x286xf32, #tpu.memory_space<vmem>>, vector<1x286xf32>
    tpu.vector_store %arg6[%c56, %c0_32], %30 {strides = array<i32>} : memref<72x286xf32, #tpu.memory_space<vmem>>, vector<1x286xf32>,
    %c57 = arith.constant 57 : index
    %c0_33 = arith.constant 0 : index
    %32 = vector.load %arg6[%c57, %c0_33] : memref<72x286xf32, #tpu.memory_space<vmem>>, vector<7x286xf32>
    tpu.vector_store %arg6[%c57, %c0_33], %0 {strides = array<i32>} : memref<72x286xf32, #tpu.memory_space<vmem>>, vector<7x286xf32>,
    %c0_34 = arith.constant 0 : index
    %c0_35 = arith.constant 0 : index
    %c38 = arith.constant 38 : index
    %33 = vector.load %arg1[%c0_34, %c0_35, %c38] : memref<1x1x324xf32, #tpu.memory_space<vmem>>, vector<1x1x286xf32>
    %34 = vector.shape_cast %33 : vector<1x1x286xf32> to vector<1x286xf32>
    %c64 = arith.constant 64 : index
    %c0_36 = arith.constant 0 : index
    %35 = vector.load %arg6[%c64, %c0_36] : memref<72x286xf32, #tpu.memory_space<vmem>>, vector<1x286xf32>
    tpu.vector_store %arg6[%c64, %c0_36], %34 {strides = array<i32>} : memref<72x286xf32, #tpu.memory_space<vmem>>, vector<1x286xf32>,
    %c65 = arith.constant 65 : index
    %c0_37 = arith.constant 0 : index
    %36 = vector.load %arg6[%c65, %c0_37] : memref<72x286xf32, #tpu.memory_space<vmem>>, vector<7x286xf32>
    tpu.vector_store %arg6[%c65, %c0_37], %0 {strides = array<i32>} : memref<72x286xf32, #tpu.memory_space<vmem>>, vector<7x286xf32>,
    %c0_38 = arith.constant 0 : index
    %c0_39 = arith.constant 0 : index
    %37 = vector.load %arg3[%c0_38, %c0_39] : memref<4x72xf32, #tpu.memory_space<vmem>>, vector<4x72xf32>
    %c0_40 = arith.constant 0 : index
    %c0_41 = arith.constant 0 : index
    %38 = vector.load %arg6[%c0_40, %c0_41] : memref<72x286xf32, #tpu.memory_space<vmem>>, vector<72x286xf32>
    %cst_42 = arith.constant dense<0.000000e+00> : vector<4x286xf32>
    %39 = tpu.matmul %37, %38, %cst_42 {dimension_numbers = #tpu.dot_dimension_numbers<[1], [0], [0], [1], [0, 0, 1, 1], [], []>} : vector<4x72xf32>, vector<72x286xf32>, vector<4x286xf32> -> vector<4x286xf32>
    %c0_43 = arith.constant 0 : index
    %c0_44 = arith.constant 0 : index
    %40 = vector.load %arg4[%c0_43, %c0_44] : memref<4x1xf32, #tpu.memory_space<vmem>>, vector<4x1xf32>
    %41 = vector.broadcast %40 : vector<4x1xf32> to vector<4x286xf32>
    %42 = arith.addf %39, %41 : vector<4x286xf32>
    %cst_45 = arith.constant 0.000000e+00 : f32
    %43 = vector.broadcast %cst_45 : f32 to vector<4x286xf32>
    %44 = arith.maximumf %42, %43 : vector<4x286xf32>
    %45 = vector.extract_strided_slice %44 {offsets = [0, 0], sizes = [4, 16], strides = [1, 1]} : vector<4x286xf32> to vector<4x16xf32>
    %c0_46 = arith.constant 0 : index
    %c0_47 = arith.constant 0 : index
    %c0_48 = arith.constant 0 : index
    %46 = vector.load %arg5[%c0_46, %c0_47, %c0_48] : memref<1x4x256xf32, #tpu.memory_space<vmem>>, vector<1x4x16xf32>
    %47 = vector.shape_cast %46 : vector<1x4x16xf32> to vector<4x16xf32>
    %48 = vector.shape_cast %45 : vector<4x16xf32> to vector<1x4x16xf32>
    tpu.vector_store %arg5[%c0_46, %c0_47, %c0_48], %48 {strides = array<i32>} : memref<1x4x256xf32, #tpu.memory_space<vmem>>, vector<1x4x16xf32>,
    %49 = vector.extract_strided_slice %44 {offsets = [0, 18], sizes = [4, 16], strides = [1, 1]} : vector<4x286xf32> to vector<4x16xf32>
    %c0_49 = arith.constant 0 : index
    %c0_50 = arith.constant 0 : index
    %c16_51 = arith.constant 16 : index
    %50 = vector.load %arg5[%c0_49, %c0_50, %c16_51] : memref<1x4x256xf32, #tpu.memory_space<vmem>>, vector<1x4x16xf32>
    %51 = vector.shape_cast %50 : vector<1x4x16xf32> to vector<4x16xf32>
    %52 = vector.shape_cast %49 : vector<4x16xf32> to vector<1x4x16xf32>
    tpu.vector_store %arg5[%c0_49, %c0_50, %c16_51], %52 {strides = array<i32>} : memref<1x4x256xf32, #tpu.memory_space<vmem>>, vector<1x4x16xf32>,
    %53 = vector.extract_strided_slice %44 {offsets = [0, 36], sizes = [4, 16], strides = [1, 1]} : vector<4x286xf32> to vector<4x16xf32>
    %c0_52 = arith.constant 0 : index
    %c0_53 = arith.constant 0 : index
    %c32_54 = arith.constant 32 : index
    %54 = vector.load %arg5[%c0_52, %c0_53, %c32_54] : memref<1x4x256xf32, #tpu.memory_space<vmem>>, vector<1x4x16xf32>
    %55 = vector.shape_cast %54 : vector<1x4x16xf32> to vector<4x16xf32>
    %56 = vector.shape_cast %53 : vector<4x16xf32> to vector<1x4x16xf32>
    tpu.vector_store %arg5[%c0_52, %c0_53, %c32_54], %56 {strides = array<i32>} : memref<1x4x256xf32, #tpu.memory_space<vmem>>, vector<1x4x16xf32>,
    %57 = vector.extract_strided_slice %44 {offsets = [0, 54], sizes = [4, 16], strides = [1, 1]} : vector<4x286xf32> to vector<4x16xf32>
    %c0_55 = arith.constant 0 : index
    %c0_56 = arith.constant 0 : index
    %c48_57 = arith.constant 48 : index
    %58 = vector.load %arg5[%c0_55, %c0_56, %c48_57] : memref<1x4x256xf32, #tpu.memory_space<vmem>>, vector<1x4x16xf32>
    %59 = vector.shape_cast %58 : vector<1x4x16xf32> to vector<4x16xf32>
    %60 = vector.shape_cast %57 : vector<4x16xf32> to vector<1x4x16xf32>
    tpu.vector_store %arg5[%c0_55, %c0_56, %c48_57], %60 {strides = array<i32>} : memref<1x4x256xf32, #tpu.memory_space<vmem>>, vector<1x4x16xf32>,
    %61 = vector.extract_strided_slice %44 {offsets = [0, 72], sizes = [4, 16], strides = [1, 1]} : vector<4x286xf32> to vector<4x16xf32>
    %c0_58 = arith.constant 0 : index
    %c0_59 = arith.constant 0 : index
    %c64_60 = arith.constant 64 : index
    %62 = vector.load %arg5[%c0_58, %c0_59, %c64_60] : memref<1x4x256xf32, #tpu.memory_space<vmem>>, vector<1x4x16xf32>
    %63 = vector.shape_cast %62 : vector<1x4x16xf32> to vector<4x16xf32>
    %64 = vector.shape_cast %61 : vector<4x16xf32> to vector<1x4x16xf32>
    tpu.vector_store %arg5[%c0_58, %c0_59, %c64_60], %64 {strides = array<i32>} : memref<1x4x256xf32, #tpu.memory_space<vmem>>, vector<1x4x16xf32>,
    %65 = vector.extract_strided_slice %44 {offsets = [0, 90], sizes = [4, 16], strides = [1, 1]} : vector<4x286xf32> to vector<4x16xf32>
    %c0_61 = arith.constant 0 : index
    %c0_62 = arith.constant 0 : index
    %c80 = arith.constant 80 : index
    %66 = vector.load %arg5[%c0_61, %c0_62, %c80] : memref<1x4x256xf32, #tpu.memory_space<vmem>>, vector<1x4x16xf32>
    %67 = vector.shape_cast %66 : vector<1x4x16xf32> to vector<4x16xf32>
    %68 = vector.shape_cast %65 : vector<4x16xf32> to vector<1x4x16xf32>
    tpu.vector_store %arg5[%c0_61, %c0_62, %c80], %68 {strides = array<i32>} : memref<1x4x256xf32, #tpu.memory_space<vmem>>, vector<1x4x16xf32>,
    %69 = vector.extract_strided_slice %44 {offsets = [0, 108], sizes = [4, 16], strides = [1, 1]} : vector<4x286xf32> to vector<4x16xf32>
    %c0_63 = arith.constant 0 : index
    %c0_64 = arith.constant 0 : index
    %c96 = arith.constant 96 : index
    %70 = vector.load %arg5[%c0_63, %c0_64, %c96] : memref<1x4x256xf32, #tpu.memory_space<vmem>>, vector<1x4x16xf32>
    %71 = vector.shape_cast %70 : vector<1x4x16xf32> to vector<4x16xf32>
    %72 = vector.shape_cast %69 : vector<4x16xf32> to vector<1x4x16xf32>
    tpu.vector_store %arg5[%c0_63, %c0_64, %c96], %72 {strides = array<i32>} : memref<1x4x256xf32, #tpu.memory_space<vmem>>, vector<1x4x16xf32>,
    %73 = vector.extract_strided_slice %44 {offsets = [0, 126], sizes = [4, 16], strides = [1, 1]} : vector<4x286xf32> to vector<4x16xf32>
    %c0_65 = arith.constant 0 : index
    %c0_66 = arith.constant 0 : index
    %c112 = arith.constant 112 : index
    %74 = vector.load %arg5[%c0_65, %c0_66, %c112] : memref<1x4x256xf32, #tpu.memory_space<vmem>>, vector<1x4x16xf32>
    %75 = vector.shape_cast %74 : vector<1x4x16xf32> to vector<4x16xf32>
    %76 = vector.shape_cast %73 : vector<4x16xf32> to vector<1x4x16xf32>
    tpu.vector_store %arg5[%c0_65, %c0_66, %c112], %76 {strides = array<i32>} : memref<1x4x256xf32, #tpu.memory_space<vmem>>, vector<1x4x16xf32>,
    %77 = vector.extract_strided_slice %44 {offsets = [0, 144], sizes = [4, 16], strides = [1, 1]} : vector<4x286xf32> to vector<4x16xf32>
    %c0_67 = arith.constant 0 : index
    %c0_68 = arith.constant 0 : index
    %c128 = arith.constant 128 : index
    %78 = vector.load %arg5[%c0_67, %c0_68, %c128] : memref<1x4x256xf32, #tpu.memory_space<vmem>>, vector<1x4x16xf32>
    %79 = vector.shape_cast %78 : vector<1x4x16xf32> to vector<4x16xf32>
    %80 = vector.shape_cast %77 : vector<4x16xf32> to vector<1x4x16xf32>
    tpu.vector_store %arg5[%c0_67, %c0_68, %c128], %80 {strides = array<i32>} : memref<1x4x256xf32, #tpu.memory_space<vmem>>, vector<1x4x16xf32>,
    %81 = vector.extract_strided_slice %44 {offsets = [0, 162], sizes = [4, 16], strides = [1, 1]} : vector<4x286xf32> to vector<4x16xf32>
    %c0_69 = arith.constant 0 : index
    %c0_70 = arith.constant 0 : index
    %c144 = arith.constant 144 : index
    %82 = vector.load %arg5[%c0_69, %c0_70, %c144] : memref<1x4x256xf32, #tpu.memory_space<vmem>>, vector<1x4x16xf32>
    %83 = vector.shape_cast %82 : vector<1x4x16xf32> to vector<4x16xf32>
    %84 = vector.shape_cast %81 : vector<4x16xf32> to vector<1x4x16xf32>
    tpu.vector_store %arg5[%c0_69, %c0_70, %c144], %84 {strides = array<i32>} : memref<1x4x256xf32, #tpu.memory_space<vmem>>, vector<1x4x16xf32>,
    %85 = vector.extract_strided_slice %44 {offsets = [0, 180], sizes = [4, 16], strides = [1, 1]} : vector<4x286xf32> to vector<4x16xf32>
    %c0_71 = arith.constant 0 : index
    %c0_72 = arith.constant 0 : index
    %c160 = arith.constant 160 : index
    %86 = vector.load %arg5[%c0_71, %c0_72, %c160] : memref<1x4x256xf32, #tpu.memory_space<vmem>>, vector<1x4x16xf32>
    %87 = vector.shape_cast %86 : vector<1x4x16xf32> to vector<4x16xf32>
    %88 = vector.shape_cast %85 : vector<4x16xf32> to vector<1x4x16xf32>
    tpu.vector_store %arg5[%c0_71, %c0_72, %c160], %88 {strides = array<i32>} : memref<1x4x256xf32, #tpu.memory_space<vmem>>, vector<1x4x16xf32>,
    %89 = vector.extract_strided_slice %44 {offsets = [0, 198], sizes = [4, 16], strides = [1, 1]} : vector<4x286xf32> to vector<4x16xf32>
    %c0_73 = arith.constant 0 : index
    %c0_74 = arith.constant 0 : index
    %c176 = arith.constant 176 : index
    %90 = vector.load %arg5[%c0_73, %c0_74, %c176] : memref<1x4x256xf32, #tpu.memory_space<vmem>>, vector<1x4x16xf32>
    %91 = vector.shape_cast %90 : vector<1x4x16xf32> to vector<4x16xf32>
    %92 = vector.shape_cast %89 : vector<4x16xf32> to vector<1x4x16xf32>
    tpu.vector_store %arg5[%c0_73, %c0_74, %c176], %92 {strides = array<i32>} : memref<1x4x256xf32, #tpu.memory_space<vmem>>, vector<1x4x16xf32>,
    %93 = vector.extract_strided_slice %44 {offsets = [0, 216], sizes = [4, 16], strides = [1, 1]} : vector<4x286xf32> to vector<4x16xf32>
    %c0_75 = arith.constant 0 : index
    %c0_76 = arith.constant 0 : index
    %c192 = arith.constant 192 : index
    %94 = vector.load %arg5[%c0_75, %c0_76, %c192] : memref<1x4x256xf32, #tpu.memory_space<vmem>>, vector<1x4x16xf32>
    %95 = vector.shape_cast %94 : vector<1x4x16xf32> to vector<4x16xf32>
    %96 = vector.shape_cast %93 : vector<4x16xf32> to vector<1x4x16xf32>
    tpu.vector_store %arg5[%c0_75, %c0_76, %c192], %96 {strides = array<i32>} : memref<1x4x256xf32, #tpu.memory_space<vmem>>, vector<1x4x16xf32>,
    %97 = vector.extract_strided_slice %44 {offsets = [0, 234], sizes = [4, 16], strides = [1, 1]} : vector<4x286xf32> to vector<4x16xf32>
    %c0_77 = arith.constant 0 : index
    %c0_78 = arith.constant 0 : index
    %c208 = arith.constant 208 : index
    %98 = vector.load %arg5[%c0_77, %c0_78, %c208] : memref<1x4x256xf32, #tpu.memory_space<vmem>>, vector<1x4x16xf32>
    %99 = vector.shape_cast %98 : vector<1x4x16xf32> to vector<4x16xf32>
    %100 = vector.shape_cast %97 : vector<4x16xf32> to vector<1x4x16xf32>
    tpu.vector_store %arg5[%c0_77, %c0_78, %c208], %100 {strides = array<i32>} : memref<1x4x256xf32, #tpu.memory_space<vmem>>, vector<1x4x16xf32>,
    %101 = vector.extract_strided_slice %44 {offsets = [0, 252], sizes = [4, 16], strides = [1, 1]} : vector<4x286xf32> to vector<4x16xf32>
    %c0_79 = arith.constant 0 : index
    %c0_80 = arith.constant 0 : index
    %c224 = arith.constant 224 : index
    %102 = vector.load %arg5[%c0_79, %c0_80, %c224] : memref<1x4x256xf32, #tpu.memory_space<vmem>>, vector<1x4x16xf32>
    %103 = vector.shape_cast %102 : vector<1x4x16xf32> to vector<4x16xf32>
    %104 = vector.shape_cast %101 : vector<4x16xf32> to vector<1x4x16xf32>
    tpu.vector_store %arg5[%c0_79, %c0_80, %c224], %104 {strides = array<i32>} : memref<1x4x256xf32, #tpu.memory_space<vmem>>, vector<1x4x16xf32>,
    %105 = vector.extract_strided_slice %44 {offsets = [0, 270], sizes = [4, 16], strides = [1, 1]} : vector<4x286xf32> to vector<4x16xf32>
    %c0_81 = arith.constant 0 : index
    %c0_82 = arith.constant 0 : index
    %c240 = arith.constant 240 : index
    %106 = vector.load %arg5[%c0_81, %c0_82, %c240] : memref<1x4x256xf32, #tpu.memory_space<vmem>>, vector<1x4x16xf32>
    %107 = vector.shape_cast %106 : vector<1x4x16xf32> to vector<4x16xf32>
    %108 = vector.shape_cast %105 : vector<4x16xf32> to vector<1x4x16xf32>
    tpu.vector_store %arg5[%c0_81, %c0_82, %c240], %108 {strides = array<i32>} : memref<1x4x256xf32, #tpu.memory_space<vmem>>, vector<1x4x16xf32>,
    %c0_83 = arith.constant 0 : index
    %c0_84 = arith.constant 0 : index
    %c0_85 = arith.constant 0 : index
    %109 = vector.load %arg5[%c0_83, %c0_84, %c0_85] : memref<1x4x256xf32, #tpu.memory_space<vmem>>, vector<1x4x256xf32>
    %110 = vector.shape_cast %109 : vector<1x4x256xf32> to vector<4x256xf32>
    %c0_86 = arith.constant 0 : index
    %c0_87 = arith.constant 0 : index
    %c0_88 = arith.constant 0 : index
    %111 = vector.load %arg2[%c0_86, %c0_87, %c0_88] : memref<1x4x256xf32, #tpu.memory_space<vmem>>, vector<1x4x256xf32>
    %112 = vector.shape_cast %111 : vector<1x4x256xf32> to vector<4x256xf32>
    %113 = arith.addf %110, %112 : vector<4x256xf32>
    %c0_89 = arith.constant 0 : index
    %c0_90 = arith.constant 0 : index
    %c0_91 = arith.constant 0 : index
    %114 = vector.load %arg5[%c0_89, %c0_90, %c0_91] : memref<1x4x256xf32, #tpu.memory_space<vmem>>, vector<1x4x256xf32>
    %115 = vector.shape_cast %114 : vector<1x4x256xf32> to vector<4x256xf32>
    %116 = vector.shape_cast %113 : vector<4x256xf32> to vector<1x4x256xf32>
    tpu.vector_store %arg5[%c0_89, %c0_90, %c0_91], %116 {strides = array<i32>} : memref<1x4x256xf32, #tpu.memory_space<vmem>>, vector<1x4x256xf32>,
    return
  }
  func.func @transform_0(%arg0: i32) -> (i32, i32, i32) {
    %c0_i32 = arith.constant 0 : i32
    %c0_i32_0 = arith.constant 0 : i32
    %c0_i32_1 = arith.constant 0 : i32
    return %arg0, %c0_i32, %c0_i32_0 : i32, i32, i32
  }
  func.func @transform_1(%arg0: i32) -> (i32, i32, i32) {
    %c0_i32 = arith.constant 0 : i32
    %c0_i32_0 = arith.constant 0 : i32
    %c0_i32_1 = arith.constant 0 : i32
    return %arg0, %c0_i32, %c0_i32_0 : i32, i32, i32
  }
  func.func @transform_2(%arg0: i32) -> (i32, i32) {
    %c0_i32 = arith.constant 0 : i32
    %c0_i32_0 = arith.constant 0 : i32
    %c0_i32_1 = arith.constant 0 : i32
    return %c0_i32, %c0_i32_0 : i32, i32
  }
  func.func @transform_3(%arg0: i32) -> (i32, i32) {
    %c0_i32 = arith.constant 0 : i32
    %c0_i32_0 = arith.constant 0 : i32
    %c0_i32_1 = arith.constant 0 : i32
    return %c0_i32, %c0_i32_0 : i32, i32
  }
  func.func @transform_4(%arg0: i32) -> (i32, i32, i32) {
    %c0_i32 = arith.constant 0 : i32
    %c0_i32_0 = arith.constant 0 : i32
    %c0_i32_1 = arith.constant 0 : i32
    return %arg0, %c0_i32, %c0_i32_0 : i32, i32, i32
  }
}

</mosaic_0001>

<bundles_post_ra>
// kernel: tpu_custom_call.1
= control target key start
LH: loop header
LB: loop body
LE: loop exit
PB: predicated region body
PF: predicated region fallthrough
CT: control target
= control target key end

     0   :  { %9 = vsyncpa [#allocation4], 0  ;;  %s1415_s0 = inlined_call_operand.hbm [shape: f32[2,1,324], index: 0, kind: input, shape index: {}]   ;;  %s1416_s1 = inlined_call_operand.hbm [shape: f32[2,4,256], index: 1, kind: input, shape index: {}]   ;;  %s1417_s2 = inlined_call_operand.vmem [shape: f32[4,72], index: 2, kind: input, shape index: {}]   ;;  %s1418_s3 = inlined_call_operand.vmem [shape: f32[4,1], index: 3, kind: input, shape index: {}]   ;;  %s1419_s4 = inlined_call_operand.hbm [shape: f32[2,4,256], index: 4, kind: output, shape index: {}]  }
   0x1   :  { %11 = vsyncpa [#allocation4 + $0x1], 0 }
   0x2   :  { %12 = vsyncpa [#allocation7], 0 }
   0x3   :  { %14 = vsyncpa [#allocation7 + $0x1], 0 }
   0x4   :  { %15 = vsyncpa [#allocation5], 0 }
   0x5   :  { %17 = vsyncpa [#allocation5 + $0x1], 0  ;;  %s1090_s15 = smov 0   ;;  %s1092_s16 = smov 0  }
   0x6   :  { %s1094_s17 = smov 0   ;;  %s1096_s18 = smov 0  }
   0x7 LB: > { %s1111_s19 = sadd.s32 4294967295, %s1036_s18   ;;  %s749_s20 = sadd.s32 4294967294, %s1036_s18   ;;  %s1036_s18 = sphi %s1096_s18, %s1439_s18   ;;  %s1032_s17 = sphi %s1094_s17, %s1438_s17   ;;  %s1028_s16 = sphi %s1092_s16, %s1437_s16   ;;  %s1024_s15 = sphi %s1090_s15, %s1436_s15  }
   0x8   : > { %s1115_s21 = sadd.s32 1, %s1036_s18   ;;  %s30_s22 = sadd.s32 1, %s1032_s17 }
   0x9   : > { %s27_s23 = ssub.s32 %s1036_s18, %s1115_s21  ;;  %p37_p0 = scmp.ne.s32.totalorder %s1032_s17, %s1028_s16 }
   0xa   : > { %p28_p1 = scmp.eq.s32.totalorder %s27_s23, 0  ;;  %p38_p2 = scmp.eq.s32.totalorder %s1036_s18, 0 }
   0xb   : > { %p43_p3 = scmp.ne.s32.totalorder %s1028_s16, %s1024_s15  ;;  %p44_p4 = scmp.eq.s32.totalorder %s1111_s19, 0 }
   0xc   : > { %s1127_s24 = scalar_select %p28_p1, %s1032_s17, %s30_s22  }
   0xd   : > { %p39_p5 = por %p38_p2, %p37_p0  ;;  %p1129_p6 = por %p44_p4, %p43_p3 }
   0xe   : > { %p135_p7 = scmp.eq.s32.totalorder %s1111_s19, 1  ;;  %p141_p8 = scmp.eq.s32.totalorder %s749_s20, 1 }
   0xf   : > { %s1422_s25 = scalar_select %p1129_p6, 1, 0 }
  0x10   : > { %p847_p10 = scmp.lt.s32.totalorder %s1036_s18, 2  ;;  %p1136_p11 = por %p135_p7, %p37_p0 }
  0x11   : > { %p1140_p12 = por %p141_p8, %p43_p3  ;;  %s1145_s28 = sand.u32 1, %s1032_s17  }
  0x12   : > { %s1423_s26 = scalar_select %p1136_p11, 1, 0 }
  0x13   : > { %s1424_s27 = scalar_select %p1140_p12, 1, 0 }
  0x14   : > { %s828_s29 = smul.u32 48, %s1036_s18  ;;  %p1154_p13 = pnand %p847_p10, %p39_p5 }
  0x15   : > { %s827_s30 = smul.u32 3, %s1145_s28  ;;  %s168_s11 = scalar_lea.sflag [#allocation4], %s1145_s28 }
  0x16   : > { %s1152_s7 = scalar_lea.hbm %s1415_s0, %s828_s29  ;;  %p908_p3 = pneg %p1154_p13 }
  0x17   : > { %s171_s9 = scalar_lea.vmem [#allocation3], %s827_s30  ;;  %s906_s12 = scalar_lea.hbm %s1152_s7, 48 }
  0x18   : > { %s179_s10 = sshll.u32 %s171_s9, 4  ;;  %p907_p2 = scmp.ne.s32.totalorder %s1152_s7, %s906_s12  ;;  %s1159_s10 = int_to_ptr.vmem [resolvable:$true] %s179_s10 }
  0x19   : > { %s911_s20 = scalar_lea.hbm %s1415_s0, 96  ;;  %p912_p7 = scmp.lt.u32.totalorder %s1152_s7, %s1415_s0 }
  0x1a   : > { %p909_p4 = pnand %p908_p3, %p907_p2  ;;  %p913_p8 = scmp.lt.u32.totalorder %s911_s20, %s906_s12 }
  0x1b   : > { %p915_p9 = scmp.lt.u32.totalorder %s906_s12, %s1152_s7 }
  0x1c   : > { %p910_p5 = pneg %p909_p4  ;;  %p914_p10 = por %p913_p8, %p912_p7 }
  0x1e   : > { %p916_p0 = por %p915_p9, %p914_p10 }
  0x20   : > { %p917_p1 = pnand %p916_p0, %p910_p5 }
  0x22   : > { %920 = shalt.err (!%p917_p1)
}
  0x23   : > { %s921_s29 = scalar_lea.vmem %s1159_s10, 48  ;;  %s1038_s30 = smov [#allocation3]  }
  0x24   : > { %p922_p2 = scmp.ne.s32.totalorder %s1159_s10, %s921_s29  ;;  %s926_s5 = sshll.u32 %s1038_s30, 4  ;;  %s927_s5 = int_to_ptr.vmem [resolvable:$false] %s926_s5 }
  0x25   : > { %s928_s6 = scalar_lea.vmem %s927_s5, 96  ;;  %p929_p11 = scmp.lt.s32.totalorder %s1159_s10, %s927_s5 }
  0x26   : > { %p924_p4 = pnand %p922_p2, %p908_p3  ;;  %p930_p7 = scmp.lt.s32.totalorder %s928_s6, %s921_s29 }
  0x28   : > { %p925_p12 = pneg %p924_p4  ;;  %p931_p8 = por %p930_p7, %p929_p11 }
  0x2a   : > { %p932_p9 = pnand %p931_p8, %p925_p12 }
  0x2c   : > { %935 = shalt.err (!%p932_p9)
}
  0x2d   : > { %839 = dma.hbm_to_vmem [thread:$0]  (!%p1154_p13), %s1152_s7, 48, %s1159_s10, %s168_s11  }
  0x2e   : > { %p1426_p0 = scmp.lt.s32.totalorder %s1036_s18, 3  ;;  %p1427_p1 = scmp.ge.s32.totalorder %s1036_s18, 1 }
  0x2f   : > { %s753_s12 = sshll.u32 %s1145_s28, 3  ;;  %s766_s13 = sshll.u32 %s1036_s18, 7 }
  0x30   : > { %p1192_p5 = pnand %p1427_p1, %p1426_p0  ;;  %s1201_s22 = scalar_lea.hbm %s1416_s1, %s766_s13 }
  0x31   : > { %s190_s23 = scalar_lea.vmem [#allocation6], %s753_s12  ;;  %s187_s7 = scalar_lea.sflag [#allocation7], %s1145_s28 }
  0x32   : > { %s1428_s9 = scalar_select %p1192_p5, 1, 0 }
  0x33   : > { %s198_s29 = sshll.u32 %s190_s23, 4  ;;  %s936_s10 = scalar_lea.hbm %s1201_s22, 128  ;;  %s199_s29 = int_to_ptr.vmem [resolvable:$true] %s198_s29 }
  0x34   : > { %p937_p11 = scmp.ne.s32.totalorder %s1201_s22, %s936_s10  ;;  %s941_s5 = scalar_lea.hbm %s1416_s1, 256 }
  0x35   : > { %p942_p2 = scmp.lt.u32.totalorder %s1201_s22, %s1416_s1  ;;  %p943_p4 = scmp.lt.u32.totalorder %s941_s5, %s936_s10 }
  0x36   : > { %p939_p12 = pnand %p937_p11, %p908_p3  ;;  %p945_p8 = scmp.lt.u32.totalorder %s936_s10, %s1201_s22 }
  0x37   : > { %p944_p7 = por %p943_p4, %p942_p2 }
  0x38   : > { %p940_p10 = pneg %p939_p12 }
  0x39   : > { %p946_p9 = por %p945_p8, %p944_p7 }
  0x3b   : > { %p947_p0 = pnand %p946_p9, %p940_p10 }
  0x3d   : > { %950 = shalt.err (!%p947_p0)
}
  0x3e   : > { %s951_s28 = scalar_lea.vmem %s199_s29, 128  ;;  %s1039_s12 = smov [#allocation6]  }
  0x3f   : > { %p952_p1 = scmp.ne.s32.totalorder %s199_s29, %s951_s28  ;;  %s956_s14 = sshll.u32 %s1039_s12, 4  ;;  %s957_s14 = int_to_ptr.vmem [resolvable:$false] %s956_s14 }
  0x40   : > { %s958_s20 = scalar_lea.vmem %s957_s14, 256  ;;  %p959_p6 = scmp.lt.s32.totalorder %s199_s29, %s957_s14 }
  0x41   : > { %p954_p11 = pnand %p952_p1, %p908_p3  ;;  %p960_p5 = scmp.lt.s32.totalorder %s958_s20, %s951_s28 }
  0x43   : > { %p955_p12 = pneg %p954_p11  ;;  %p961_p2 = por %p960_p5, %p959_p6 }
  0x45   : > { %p962_p4 = pnand %p961_p2, %p955_p12 }
  0x47   : > { %965 = shalt.err (!%p962_p4)
}
  0x48   : > { %842 = dma.hbm_to_vmem [thread:$0]  (!%p1154_p13), %s1201_s22, 128, %s199_s29, %s187_s7  }
  0x49   : > { %p1429_p10 = scmp.ne.s32.totalorder %s1428_s9, 0 }
  0x4a   : > { %s1226_s23 = sand.u32 (!%p1429_p10), 1, %s1028_s16   ;;  %p1430_p6 = scmp.ne.s32.totalorder (!%p1429_p10), %s1422_s25, 0 }
  0x4b   : > { %207 = sbr.rel (%p1429_p10) target bundleno = 619 (0x26b), region = 36  ;;  %s210_s11 = scalar_lea.sflag (!%p1429_p10), [#allocation4], %s1226_s23 }
  0x4c   : > { %s829_s10 = smul.u32 (!%p1429_p10), 3, %s1226_s23 }
  0x4e   : > { %s1230_s30 = scalar_lea.vmem (!%p1429_p10), [#allocation3], %s829_s10 }
  0x52   : > { %1011 = dma.done.wait (%p1430_p6), %s210_s11, 48  }
  0x53   : > { %1013 = vsyncadd (%p1430_p6), %s210_s11, 4294967248  ;;  %s757_s8 = sshll.u32 %s1226_s23, 3  ;;  %s219_s9 = scalar_lea.sflag [#allocation7], %s1226_s23 }
  0x54   : > { %s1240_s22 = scalar_lea.vmem [#allocation6], %s757_s8 }
  0x55   : > { %1015 = dma.done.wait (%p1430_p6), %s219_s9, 128  }
  0x56   : > { %1017 = vsyncadd (%p1430_p6), %s219_s9, 4294967168  ;;  %vm261_vm0 = vcmask 244737   ;;  %v1040_v0 = vmov 0.0   ;;  %v253_v1 = vlaneseq  ;;  %v263_v2 = vld [vmem:[%s1230_s30] sm:$0x7]  ;;  %v1041_v4 = vmov 0.0|0.0  }
  0x57   : > { %260 = vst [vmem:[#allocation2 + $0x8] sm:$0xfe] %v1040_v0  ;;  %275 = vst [vmem:[#allocation2 + $0x20] sm:$0xfe] %v1040_v0  ;;  %477 = vmatprep.mubr.f32.mxu0 %v1040_v0  ;;  %v291_v3 = vld [vmem:[%s1230_s30] sm:$0x7]  ;;  %815 = vmatprep.subr.bf16.mxu1 %v1041_v4 }
  0x58   : > { %259 = vst [vmem:[#allocation2] sm:$0xfe] %v1040_v0  ;;  %274 = vst [vmem:[#allocation2 + $0x18] sm:$0xfe] %v1040_v0  ;;  %s1042_s25 = smov 127   ;;  %s1043_s29 = smov 110  }
  0x59   : > { %288 = vst [vmem:[#allocation2 + $0x30] sm:$0xfe] %v1040_v0  ;;  %289 = vst [vmem:[#allocation2 + $0x38] sm:$0xfe] %v1040_v0  ;;  %265 = vrot.lane.b32.xlu0 %v263_v2, %s1042_s25  ;;  %293 = vrot.lane.b32.xlu1 %v291_v3, %s1043_s29  ;;  %vm1287_vm1 = vcmp.lt.s32.totalorder %v253_v1, 286  ;;  %s1044_s7 = smov 126  }
  0x5a   : > { %302 = vst [vmem:[#allocation2 + $0x48] sm:$0xfe] %v1040_v0  ;;  %303 = vst [vmem:[#allocation2 + $0x50] sm:$0xfe] %v1040_v0  ;;  %v277_v6 = vld [vmem:[%s1230_s30] sm:$0x7] }
  0x5b   : > { %316 = vst [vmem:[#allocation2 + $0x60] sm:$0xfe] %v1040_v0  ;;  %317 = vst [vmem:[#allocation2 + $0x68] sm:$0xfe] %v1040_v0  ;;  %v305_v7 = vld [vmem:[%s1230_s30] sm:$0x7] }
  0x5c   : > { %330 = vst [vmem:[#allocation2 + $0x78] sm:$0xfe] %v1040_v0  ;;  %331 = vst [vmem:[#allocation2 + $0x80] sm:$0xfe] %v1040_v0  ;;  %v252_v8 = vld [vmem:[%s1230_s30] sm:$0x7] }
  0x5d   : > { %344 = vst [vmem:[#allocation2 + $0x90] sm:$0xfe] %v1040_v0  ;;  %345 = vst [vmem:[#allocation2 + $0x98] sm:$0xfe] %v1040_v0  ;;  %279 = vrot.lane.b32.xlu0 %v277_v6, %s1044_s7  ;;  %s1045_s5 = smov 109   ;;  %s1046_s6 = smov 108  }
  0x5e   : > { %358 = vst [vmem:[#allocation2 + $0xa8] sm:$0xfe] %v1040_v0  ;;  %359 = vst [vmem:[#allocation2 + $0xb0] sm:$0xfe] %v1040_v0  ;;  %307 = vrot.lane.b32.xlu1 %v305_v7, %s1045_s5  ;;  %v319_v9 = vld [vmem:[%s1230_s30] sm:$0x7] }
  0x5f   : > { %372 = vst [vmem:[#allocation2 + $0xc0] sm:$0xfe] %v1040_v0  ;;  %373 = vst [vmem:[#allocation2 + $0xc8] sm:$0xfe] %v1040_v0  ;;  %v333_v10 = vld [vmem:[%s1230_s30] sm:$0x7] }
  0x60   : > { %262 = vst.msk [vmem:[#allocation2 + $0x10] sm:$0xfe] %vm261_vm0, %v1040_v0  ;;  %276 = vst.msk [vmem:[#allocation2 + $0x28] sm:$0xfe] %vm261_vm0, %v1040_v0  ;;  %s1047_s13 = smov 92   ;;  %s1048_s28 = smov 91  }
  0x61   : > { %290 = vst.msk [vmem:[#allocation2 + $0x40] sm:$0xfe] %vm261_vm0, %v1040_v0  ;;  %304 = vst.msk [vmem:[#allocation2 + $0x58] sm:$0xfe] %vm261_vm0, %v1040_v0  ;;  %321 = vrot.lane.b32.xlu0 %v319_v9, %s1046_s6  ;;  %v347_v11 = vld [vmem:[%s1230_s30] sm:$0x7] }
  0x62   : > { %318 = vst.msk [vmem:[#allocation2 + $0x70] sm:$0xfe] %vm261_vm0, %v1040_v0  ;;  %332 = vst.msk [vmem:[#allocation2 + $0x88] sm:$0xfe] %vm261_vm0, %v1040_v0  ;;  %335 = vrot.lane.b32.xlu1 %v333_v10, %s1047_s13  ;;  %v361_v12 = vld [vmem:[%s1230_s30] sm:$0x7] }
  0x63   : > { %346 = vst.msk [vmem:[#allocation2 + $0xa0] sm:$0xfe] %vm261_vm0, %v1040_v0  ;;  %360 = vst.msk [vmem:[#allocation2 + $0xb8] sm:$0xfe] %vm261_vm0, %v1040_v0  ;;  %s1049_s12 = smov 90   ;;  %vm1050_vm2 = vmmov 0  }
  0x64   : > { %374 = vst.msk [vmem:[#allocation2 + $0xd0] sm:$0xfe] %vm261_vm0, %v1040_v0  ;;  %796 = vmatprep.mubr.msk.f32.mxu1 %vm1050_vm2, %v1040_v0  ;;  %v403_v13 = vld [vmem:[%s1418_s3] sm:$0xf]  ;;  %v1051_v14 = vmov 0   ;;  %vm268_vm3 = vcmask 1039360  }
  0x65   : > { %257 = vst.msk [vmem:[#allocation2] ss:$8 sm:$0x7] %vm1287_vm1, %v252_v8  ;;  %349 = vrot.lane.b32.xlu0 %v347_v11, %s1048_s28  ;;  %vm296_vm4 = vcmask 900096   ;;  %vm282_vm5 = vcmask 1031168   ;;  %vm310_vm6 = vcmask 891904  }
  0x66   : > { %363 = vrot.lane.b32.xlu1 %v361_v12, %s1049_s12  ;;  %905 = vset.pattern.permute.xlu0 %v1051_v14  ;;  %vm324_vm7 = vcmask 883712   ;;  %vm338_vm8 = vcmask 752640   ;;  %vm352_vm9 = vcmask 744448   ;;  %vm366_vm10 = vcmask 736256   ;;  %v375_v14 = vld [vmem:[%s1417_s2] sm:$0xf] }
  0x67   : > { %vm409_vm11 = vcmask 588800   ;;  %vm557_vm12 = vcmask 125952   ;;  %s1052_s30 = smov 120   ;;  %s1333_s9 = scalar_lea.vmem [#allocation8], %s757_s8  ;;  %vm563_vm13 = vcmask 257152   ;;  %vm568_vm14 = vcmask 388352  }
  0x68   : > { %s1053_s25 = smov 124   ;;  %s1054_s5 = smov 122   ;;  %vm573_vm15 = vcmask 519552   ;;  %vm578_vm0 = vcmask 650752   ;;  %vm629_vm2 = vcmask 818176  }
  0x69   : > { %406 = vperm.xlu0 %905, %v403_v13   ;;  %s1055_s13 = smov 106   ;;  %s1056_s28 = smov 118  }
  0x6a   : > { %s1058_s8 = smov 112   ;;  %s1059_s12 = smov 102  }
  0x6b   : > { %s1060_s14 = smov 100   ;;  %s1062_s20 = smov 114  }
  0x6c   : > { %v377_v31 = vld [vmem:[#allocation2 + $0x8] sm:$0xff]  ;;  %v378_v32 = vld [vmem:[#allocation2 + $0x10] sm:$0xff]  ;;  %v376_v33 = vld [vmem:[#allocation2] sm:$0xff]  ;;  %s767_s10 = sshll.u32 %s1111_s19, 7  ;;  %s656_s11 = sshll.u32 %s1333_s9, 4  ;;  %s1372_s11 = int_to_ptr.vmem [resolvable:$true] %s656_s11 }
  0x6d   : > { %p1433_p3 = scmp.ne.s32.totalorder %s1423_s26, 0  ;;  %s1064_s19 = smov [#allocation8]  }
  0xcb   : > { %v266_v15 = vpop.permute.xlu0 %265  ;;  %v294_v16 = vpop.permute.xlu1 %293 }
  0xcc   : > { %v267_v17 = vrot.slane %v266_v15, 1  ;;  %v295_v18 = vrot.slane %v294_v16, 1 }
  0xce   : > { %v269_v19 = vsel %vm268_vm3, %v266_v15, %v267_v17  ;;  %v297_v20 = vsel %vm296_vm4, %v294_v16, %v295_v18  ;;  %vm588_vm3 = vcmask 913152   ;;  %vm598_vm4 = vcmask 1044352  }
  0xcf   : > { %272 = vst.msk [vmem:[#allocation2 + $0x18] ss:$8 sm:$0x7] %vm1287_vm1, %v269_v19  ;;  %300 = vst.msk [vmem:[#allocation2 + $0x48] ss:$8 sm:$0x7] %vm1287_vm1, %v297_v20  ;;  %v280_v21 = vpop.permute.xlu0 %279 }
  0xd0   : > { %v308_v22 = vpop.permute.xlu1 %307  ;;  %v281_v23 = vrot.slane %v280_v21, 1 }
  0xd1   : > { %v309_v24 = vrot.slane %v308_v22, 1 }
  0xd2   : > { %v283_v25 = vsel %vm282_vm5, %v280_v21, %v281_v23  ;;  %vm595_vm5 = vcmask 932864  }
  0xd3   : > { %v311_v26 = vsel %vm310_vm6, %v308_v22, %v309_v24  ;;  %286 = vst.msk [vmem:[#allocation2 + $0x30] ss:$8 sm:$0x7] %vm1287_vm1, %v283_v25  ;;  %v322_v27 = vpop.permute.xlu0 %321 }
  0xd4   : > { %314 = vst.msk [vmem:[#allocation2 + $0x60] ss:$8 sm:$0x7] %vm1287_vm1, %v311_v26  ;;  %v336_v28 = vpop.permute.xlu1 %335  ;;  %v323_v29 = vrot.slane %v322_v27, 1 }
  0xd5   : > { %v337_v30 = vrot.slane %v336_v28, 1 }
  0xd6   : > { %v325_v34 = vsel %vm324_vm7, %v322_v27, %v323_v29  ;;  %v380_v36 = vld [vmem:[#allocation2 + $0x20] sm:$0xff]  ;;  %v381_v37 = vld [vmem:[#allocation2 + $0x28] sm:$0xff]  ;;  %v379_v38 = vld [vmem:[#allocation2 + $0x18] sm:$0xff] }
  0xd7   : > { %v339_v35 = vsel %vm338_vm8, %v336_v28, %v337_v30  ;;  %328 = vst.msk [vmem:[#allocation2 + $0x78] ss:$8 sm:$0x7] %vm1287_vm1, %v325_v34  ;;  %v350_v39 = vpop.permute.xlu0 %349  ;;  %v799_v40 = vpack.c.bf16 %v380_v36, %v377_v31  ;;  %v816_v41 = vpack.c.bf16 %v381_v37, %v378_v32  ;;  %v801_v42 = vpack.c.bf16 %v379_v38, %v376_v33  ;;  %v386_v46 = vld [vmem:[#allocation2 + $0x50] sm:$0xff]  ;;  %v387_v47 = vld [vmem:[#allocation2 + $0x58] sm:$0xff]  ;;  %v385_v48 = vld [vmem:[#allocation2 + $0x48] sm:$0xff] }
  0xd8   : > { %342 = vst.msk [vmem:[#allocation2 + $0x90] ss:$8 sm:$0x7] %vm1287_vm1, %v339_v35  ;;  %v364_v43 = vpop.permute.xlu1 %363  ;;  %v351_v44 = vrot.slane %v350_v39, 1 }
  0xd9   : > { %v365_v45 = vrot.slane %v364_v43, 1  ;;  %800 = vmatprep.subr.bf16.mxu0 %v799_v40  ;;  %817 = vmatpush3.bf16.msra.mxu1 %v816_v41 }
  0xda   : > { %v353_v49 = vsel %vm352_vm9, %v350_v39, %v351_v44  ;;  %802 = vmatpush1.bf16.msra.mxu0 %v801_v42  ;;  %818 = vmatprep.subr.bf16.mxu1 %v1041_v4  ;;  %v383_v51 = vld [vmem:[#allocation2 + $0x38] sm:$0xff]  ;;  %v384_v52 = vld [vmem:[#allocation2 + $0x40] sm:$0xff]  ;;  %v382_v53 = vld [vmem:[#allocation2 + $0x30] sm:$0xff] }
  0xdb   : > { %v367_v50 = vsel %vm366_vm10, %v364_v43, %v365_v45  ;;  %356 = vst.msk [vmem:[#allocation2 + $0xa8] ss:$8 sm:$0x7] %vm1287_vm1, %v353_v49  ;;  %v803_v54 = vpack.c.bf16 %v386_v46, %v383_v51  ;;  %v819_v55 = vpack.c.bf16 %v387_v47, %v384_v52  ;;  %v805_v56 = vpack.c.bf16 %v385_v48, %v382_v53  ;;  %v389_v57 = vld [vmem:[#allocation2 + $0x68] sm:$0xff]  ;;  %v390_v58 = vld [vmem:[#allocation2 + $0x70] sm:$0xff]  ;;  %v388_v59 = vld [vmem:[#allocation2 + $0x60] sm:$0xff] }
  0xdc   : > { %370 = vst.msk [vmem:[#allocation2 + $0xc0] ss:$8 sm:$0x7] %vm1287_vm1, %v367_v50  ;;  %vm583_vm1 = vcmask 781952   ;;  %v638_v47 = vld [vmem:[%s1240_s22] sm:$0xff]  ;;  %s970_s22 = sshll.u32 %s1064_s19, 4  ;;  %s971_s22 = int_to_ptr.vmem [resolvable:$false] %s970_s22 }
  0xdd   : > { %804 = vmatprep.subr.bf16.mxu0 %v803_v54  ;;  %820 = vmatpush3.bf16.msra.mxu1 %v819_v55  ;;  %p973_p8 = scmp.lt.s32.totalorder %s1372_s11, %s971_s22 }
  0xde   : > { %806 = vmatpush1.bf16.msra.mxu0 %v805_v56  ;;  %821 = vmatprep.subr.bf16.mxu1 %v1041_v4  ;;  %v392_v60 = vld [vmem:[#allocation2 + $0x80] sm:$0xff]  ;;  %v393_v61 = vld [vmem:[#allocation2 + $0x88] sm:$0xff]  ;;  %v391_v62 = vld [vmem:[#allocation2 + $0x78] sm:$0xff] }
  0xdf   : > { %v807_v63 = vpack.c.bf16 %v392_v60, %v389_v57  ;;  %v822_v1 = vpack.c.bf16 %v393_v61, %v390_v58  ;;  %v809_v2 = vpack.c.bf16 %v391_v62, %v388_v59  ;;  %v395_v3 = vld [vmem:[#allocation2 + $0x98] sm:$0xff]  ;;  %v396_v5 = vld [vmem:[#allocation2 + $0xa0] sm:$0xff]  ;;  %v394_v6 = vld [vmem:[#allocation2 + $0x90] sm:$0xff] }
  0xe1   : > { %808 = vmatprep.subr.bf16.mxu0 %v807_v63  ;;  %823 = vmatpush3.bf16.msra.mxu1 %v822_v1 }
  0xe2   : > { %810 = vmatpush1.bf16.msra.mxu0 %v809_v2  ;;  %824 = vmatprep.subr.bf16.mxu1 %v1041_v4  ;;  %v398_v7 = vld [vmem:[#allocation2 + $0xb0] sm:$0xff]  ;;  %v399_v8 = vld [vmem:[#allocation2 + $0xb8] sm:$0xff]  ;;  %v397_v9 = vld [vmem:[#allocation2 + $0xa8] sm:$0xff] }
  0xe3   : > { %v811_v10 = vpack.c.bf16 %v398_v7, %v395_v3  ;;  %v825_v11 = vpack.c.bf16 %v399_v8, %v396_v5  ;;  %v813_v12 = vpack.c.bf16 %v397_v9, %v394_v6  ;;  %v401_v13 = vld [vmem:[#allocation2 + $0xc8] sm:$0xff]  ;;  %v402_v15 = vld [vmem:[#allocation2 + $0xd0] sm:$0xff]  ;;  %v400_v4 = vld [vmem:[#allocation2 + $0xc0] sm:$0xff] }
  0xe5   : > { %812 = vmatprep.subr.bf16.mxu0 %v811_v10  ;;  %826 = vmatpush3.bf16.msra.mxu1 %v825_v11 }
  0xe6   : > { %814 = vmatpush1.bf16.msra.mxu0 %v813_v12  ;;  %794 = vmatprep.subr.mxu1 %v1040_v0 }
  0xe7   : > { %429 = vmatprep.subr.mxu0 %v401_v13 }
  0xe8   : > { %v407_v16 = vpop.permute.xlu0 %406 }
  0xe9   : > { %795 = vmatpush3.msra.mxu1 %v402_v15 }
  0xea   : > { %430 = vmatpush1.msra.mxu0 %v400_v4  ;;  %797 = vmatmul.mubr.msk.f32.vlgmr.msra.gmra.mrb[0].mxu1 %vm409_vm11, %v375_v14 }
  0xeb   : > { %759 = vmatmul.mubr.msk.f32.vlgmr.msra.gmra.mrb[0].mxu0 %vm409_vm11, %v375_v14 }
 0x1bd   : > { %v550_v17 = vpop.f32.mrb[0].mxu1 }
 0x1be   : > { %v479_v18 = vpop.f32.mrb[0].mxu0  ;;  %v551_v19 = vadd.f32 %v550_v17, %v407_v16  ;;  %v798_v20 = vpop.f32.mrb[1].mxu1 }
 0x1bf   : > { %v480_v21 = vadd.f32 %v479_v18, %v407_v16  ;;  %v481_v0 = vpop.f32.mrb[1].mxu0 }
 0x1c0   : > { %v556_v22 = vmax.f32 %v551_v19, 0.0  ;;  %v482_v23 = vadd.f32 %v481_v0, %v407_v16 }
 0x1c1   : > { %v554_v24 = vmax.f32 %v480_v21, 0.0 }
 0x1c2   : > { %v555_v25 = vmax.f32 %v482_v23, 0.0 }
 0x1c3   : > { %575 = vrot.lane.b32.xlu0 %v554_v24, %s1052_s30  ;;  %560 = vrot.lane.b32.xlu1 %v554_v24, %s1044_s7  ;;  %558 = vst.msk [vmem:[%s1333_s9] sm:$0xf] %vm557_vm12, %v554_v24  ;;  %s1057_s7 = smov 104  }
 0x1c4   : > { %v625_v26 = vcombine.low %v555_v25, %v556_v22  ;;  %v591_v27 = vcombine.low %v554_v24, %v555_v25 }
 0x1c7   : > { %604 = vrot.lane.b32.xlu0 %v555_v25, %s1043_s29  ;;  %565 = vrot.lane.b32.xlu1 %v554_v24, %s1053_s25  ;;  %s1061_s29 = smov 98  }
 0x1cb   : > { %608 = vrot.lane.b32.xlu0 %v555_v25, %s1046_s6  ;;  %570 = vrot.lane.b32.xlu1 %v554_v24, %s1054_s5  ;;  %s1063_s6 = smov 116   ;;  %s1370_s5 = scalar_lea.hbm %s1419_s4, %s767_s10 }
 0x1cf   : > { %612 = vrot.lane.b32.xlu0 %v555_v25, %s1055_s13  ;;  %580 = vrot.lane.b32.xlu1 %v554_v24, %s1056_s28  ;;  %s642_s13 = scalar_lea.sflag [#allocation5], %s1226_s23  ;;  %s966_s28 = scalar_lea.vmem %s1372_s11, 128 }
 0x1d0   : > { %p967_p13 = scmp.ne.s32.totalorder %s1372_s11, %s966_s28 }
 0x1d2   : > { %p968_p5 = pnand %p967_p13, %p1433_p3 }
 0x1d3   : > { %616 = vrot.lane.b32.xlu0 %v555_v25, %s1057_s7  ;;  %600 = vrot.lane.b32.xlu1 %v555_v25, %s1058_s8  ;;  %s972_s7 = scalar_lea.vmem %s971_s22, 256 }
 0x1d4   : > { %p969_p7 = pneg %p968_p5  ;;  %p974_p9 = scmp.lt.s32.totalorder %s972_s7, %s966_s28 }
 0x1d6   : > { %p975_p0 = por %p974_p9, %p973_p8 }
 0x1d7   : > { %620 = vrot.lane.b32.xlu0 %v555_v25, %s1059_s12  ;;  %626 = vrot.lane.b32.xlu1 %v625_v26, %s1060_s14 }
 0x1d8   : > { %p976_p1 = pnand %p975_p0, %p969_p7 }
 0x1db   : > { %633 = vrot.lane.b32.xlu0 %v556_v22, %s1061_s29  ;;  %592 = vrot.lane.b32.xlu1 %v591_v27, %s1062_s20 }
 0x1df   : > { %585 = vrot.lane.b32.xlu1 %v554_v24, %s1063_s6 }
 0x235   : > { %v576_v28 = vpop.permute.xlu0 %575  ;;  %v561_v29 = vpop.permute.xlu1 %560 }
 0x236   : > { %564 = vst.msk [vmem:[%s1333_s9] sm:$0xf] %vm563_vm13, %v561_v29 }
 0x239   : > { %v605_v30 = vpop.permute.xlu0 %604  ;;  %v566_v31 = vpop.permute.xlu1 %565 }
 0x23a   : > { %569 = vst.msk [vmem:[%s1333_s9] sm:$0xf] %vm568_vm14, %v566_v31 }
 0x23d   : > { %v609_v32 = vpop.permute.xlu0 %608  ;;  %v571_v33 = vpop.permute.xlu1 %570 }
 0x23e   : > { %574 = vst.msk [vmem:[%s1333_s9] sm:$0xf] %vm573_vm15, %v571_v33 }
 0x23f   : > { %579 = vst.msk [vmem:[%s1333_s9] sm:$0xf] %vm578_vm0, %v576_v28 }
 0x241   : > { %v613_v34 = vpop.permute.xlu0 %612  ;;  %v581_v35 = vpop.permute.xlu1 %580 }
 0x242   : > { %584 = vst.msk [vmem:[%s1333_s9] sm:$0xf] %vm583_vm1, %v581_v35 }
 0x245   : > { %v617_v36 = vpop.permute.xlu0 %616  ;;  %v601_v37 = vpop.permute.xlu1 %600 }
 0x246   : > { %603 = vst.msk [vmem:[%s1333_s9 + $0x4] sm:$0xf] %vm557_vm12, %v601_v37 }
 0x247   : > { %607 = vst.msk [vmem:[%s1333_s9 + $0x4] sm:$0xf] %vm563_vm13, %v605_v30 }
 0x248   : > { %611 = vst.msk [vmem:[%s1333_s9 + $0x4] sm:$0xf] %vm568_vm14, %v609_v32 }
 0x249   : > { %615 = vst.msk [vmem:[%s1333_s9 + $0x4] sm:$0xf] %vm573_vm15, %v613_v34  ;;  %v621_v38 = vpop.permute.xlu0 %620  ;;  %v627_v39 = vpop.permute.xlu1 %626 }
 0x24a   : > { %619 = vst.msk [vmem:[%s1333_s9 + $0x4] sm:$0xf] %vm578_vm0, %v617_v36  ;;  %v628_v40 = vrot.slane %v627_v39, 4 }
 0x24b   : > { %623 = vst.msk [vmem:[%s1333_s9 + $0x4] sm:$0xf] %vm583_vm1, %v621_v38 }
 0x24c   : > { %v630_v41 = vsel %vm629_vm2, %v627_v39, %v628_v40 }
 0x24d   : > { %632 = vst.msk [vmem:[%s1333_s9 + $0x4] sm:$0xf] %vm588_vm3, %v630_v41  ;;  %v634_v42 = vpop.permute.xlu0 %633  ;;  %v593_v43 = vpop.permute.xlu1 %592 }
 0x24e   : > { %636 = vst.msk [vmem:[%s1333_s9 + $0x4] sm:$0xf] %vm598_vm4, %v634_v42  ;;  %v594_v44 = vrot.slane %v593_v43, 4 }
 0x250   : > { %v596_v46 = vsel %vm595_vm5, %v593_v43, %v594_v44 }
 0x251   : > { %v586_v45 = vpop.permute.xlu1 %585 }
 0x252   : > { %589 = vst.msk [vmem:[%s1333_s9] sm:$0xf] %vm588_vm3, %v586_v45 }
 0x253   : > { %599 = vst.msk [vmem:[%s1333_s9] sm:$0xf] %vm598_vm4, %v596_v46 }
 0x25a   : > { %v637_v48 = vld [vmem:[%s1333_s9] sm:$0xff] }
 0x25b   : > { %v639_v49 = vadd.f32 %v638_v47, %v637_v48 }
 0x25d   : > { %640 = vst [vmem:[%s1333_s9] sm:$0xff] %v639_v49 }
 0x25e   : > { %979 = shalt.err (!%p976_p1)
}
 0x25f   : > { %s980_s23 = scalar_lea.hbm %s1370_s5, 128  ;;  %s984_s12 = scalar_lea.hbm %s1419_s4, 256 }
 0x260   : > { %p981_p11 = scmp.ne.s32.totalorder %s1370_s5, %s980_s23  ;;  %p985_p4 = scmp.lt.u32.totalorder %s1370_s5, %s1419_s4 }
 0x261   : > { %p986_p10 = scmp.lt.u32.totalorder %s984_s12, %s980_s23  ;;  %p988_p13 = scmp.lt.u32.totalorder %s980_s23, %s1370_s5 }
 0x262   : > { %p982_p12 = pnand %p981_p11, %p1433_p3 }
 0x263   : > { %p987_p6 = por %p986_p10, %p985_p4 }
 0x264   : > { %p983_p2 = pneg %p982_p12 }
 0x265   : > { %p989_p5 = por %p988_p13, %p987_p6 }
 0x267   : > { %p990_p7 = pnand %p989_p5, %p983_p2 }
 0x269   : > { %993 = shalt.err (!%p990_p7)
}
 0x26a   : > { %834 = dma.vmem_to_hbm [thread:$0]  (%p1433_p3), %s1372_s11, 128, %s1370_s5, %s642_s13  }
 0x26b PF: > { %s668_s20 = sand.u32 1, %s1024_s15   ;;  %p1434_p8 = scmp.ne.s32.totalorder %s1424_s27, 0 }
 0x26c   : > { %p1435_p9 = scmp.ge.s32.totalorder %s1036_s18, 2  ;;  %s669_s6 = scalar_lea.sflag [#allocation5], %s668_s20 }
 0x26e   : > { %p844_p0 = pnand %p1435_p9, %p1434_p8 }
 0x270   : > { %1019 = dma.done.wait (!%p844_p0), %s669_s6, 128  }
 0x271   : > { %1021 = vsyncadd (!%p844_p0), %s669_s6, 4294967168  ;;  %p20_p1 = scmp.ge.s32.totalorder %s1115_s21, 4   ;;  %s1436_s15 = smov %s1028_s16 }
 0x272   : > { %s1437_s16 = smov %s1032_s17  ;;  %s1438_s17 = smov %s1127_s24 }
 0x273   : > { %s1439_s18 = smov %s1115_s21  ;;  %22 = sbr.rel (!%p20_p1) target bundleno = 7 (0x7), region = 102 }
 0x27a   :  { %674 = vsyncpa [#allocation4], 1 }
 0x27b   :  { %676 = vsyncpa [#allocation4 + $0x1], 1 }
 0x27c   :  { %677 = vsyncpa [#allocation7], 1 }
 0x27d   :  { %679 = vsyncpa [#allocation7 + $0x1], 1 }
 0x27e   :  { %680 = vsyncpa [#allocation5], 1 }
 0x27f   :  { %682 = vsyncpa [#allocation5 + $0x1], 1 }

</bundles_post_ra>
